<compile_context>
chip_gen: v5e
topology: v5e:2x2
jax: 0.10.0
libtpu: 0.0.40
codegen_flags: <defaults>
</compile_context>

<pallas_src>
import functools

import jax
import jax.numpy as jnp
from jax.experimental import pallas as pl
from jax.experimental.pallas import tpu as pltpu


def _proto_loss_kernel(mu_s_ref, f_t_ref, prop_ref,                    # inputs
                       t2p_out_ref, tmax_out_ref, tsum_out_ref, cw_out_ref,  # per-core outputs
                       inv_mu_ref, logprior_ref, t_max_ref, t_sum_ref,
                       cw_ref, t2p_acc_ref,                            # scratch
                       *, nav_t, eps, tile_m, tiles_per_core, total_m):
    core = pl.program_id(0)      # "parallel" core-split of M (2 TCs on v7x)
    step = pl.program_id(1)      # "arbitrary" tile index within this core's chunk
    last = pl.num_programs(1) - 1

    @pl.when(step == 0)
    def _init():
        mu32 = mu_s_ref[...].astype(jnp.float32)
        # 1 / max(||mu_k||, 1e-12)  (F.normalize clamp) via rsqrt of clamped sq-norm.
        inv_mu_ref[...] = jax.lax.rsqrt(
            jnp.maximum(jnp.sum(mu32 * mu32, axis=1, keepdims=True), 1e-24))
        # Hoisted per-grid invariants: log prior in f32, computed once per core.
        logprior_ref[...] = jnp.log(prop_ref[...].astype(jnp.float32) + eps)
        t_max_ref[...] = jnp.full_like(t_max_ref, -jnp.inf)
        t_sum_ref[...] = jnp.zeros_like(t_sum_ref)
        cw_ref[...] = jnp.zeros_like(cw_ref)
        t2p_acc_ref[...] = jnp.zeros_like(t2p_acc_ref)

    mu_s = mu_s_ref[...]                                   # (K, F), native dtype
    f_t = f_t_ref[...]                                     # (TM, F), native dtype
    k_cls = mu_s.shape[0]

    # ---- tail / overflow masking (grid uses cdiv, last tile may be padded) ----
    global_tile = core * tiles_per_core + step
    rem = total_m - global_tile * tile_m                   # may be <=0 or >= tile_m
    col_valid = jax.lax.broadcasted_iota(jnp.int32, (1, tile_m), 1) < rem   # (1, TM)
    col_mask = col_valid.astype(jnp.float32)
    row_valid = jax.lax.broadcasted_iota(jnp.int32, (tile_m, 1), 0) < rem   # (TM, 1)

    # Single MXU matmul for this tile: sim = mu_s @ f_t_tile.T -> (K, TM), f32 acc.
    sim = jax.lax.dot_general(
        mu_s, f_t, dimension_numbers=(((1,), (1,)), ((), ())),
        preferred_element_type=jnp.float32)
    # Sanitize padded columns (pad contents are undefined; keep everything finite).
    sim = jnp.where(col_valid, sim, 0.0)

    # Per-target inverse norms for the rank-1 cosine scaling; zero padded rows.
    ft32 = f_t.astype(jnp.float32)
    inv_ft = jax.lax.rsqrt(
        jnp.maximum(jnp.sum(ft32 * ft32, axis=1, keepdims=True), 1e-24))    # (TM, 1)
    inv_ft = jnp.where(row_valid, inv_ft, 0.0)

    a_mat = sim * inv_mu_ref[...]        # (K, TM); cos[k, m] = a_mat[k, m] * inv_ft[m]
    t_logits = sim * jnp.float32(1.0 / nav_t)              # (K, TM)

    # ---- s_dist: softmax over classes K (complete within each tile column) ----
    s_logits = t_logits + logprior_ref[...]                # (K, TM)
    s_max = jnp.max(s_logits, axis=0, keepdims=True)       # (1, TM)
    s_exp = jnp.exp(s_logits - s_max)
    s_dist = s_exp * pl.reciprocal(jnp.sum(s_exp, axis=0, keepdims=True))   # exact

    # ---- t_dist: online softmax over targets M (spans this core's tiles) ----
    row_max = jnp.max(t_logits, axis=1, keepdims=True)     # (K, 1)
    new_max = jnp.maximum(t_max_ref[...], row_max)
    alpha = jnp.exp(t_max_ref[...] - new_max)              # (K, 1)
    p = jnp.exp(t_logits - new_max) * col_mask             # masked cols contribute 0
    t_sum_ref[...] = alpha * t_sum_ref[...] + jnp.sum(p, axis=1, keepdims=True)
    t_max_ref[...] = new_max

    # One stacked (2K, TM) x (TM, 1) matvec accumulates both
    #   sum_m cos * s_dist  (rows [0, K))  and  sum_m cos * exp(.)  (rows [K, 2K)).
    stacked = jnp.concatenate([a_mat * s_dist, a_mat * p], axis=0)
    sums = jax.lax.dot_general(
        stacked, inv_ft, dimension_numbers=(((1,), (0,)), ((), ())),
        preferred_element_type=jnp.float32)                # (2K, 1)
    t2p_acc_ref[...] += sums[:k_cls]
    cw_ref[...] = alpha * cw_ref[...] + sums[k_cls:]

    @pl.when(step == last)
    def _finalize():
        # Emit this core's partial state; the cross-core merge happens in JAX.
        t2p_out_ref[...] = t2p_acc_ref[...]
        tmax_out_ref[...] = t_max_ref[...]
        tsum_out_ref[...] = t_sum_ref[...]
        cw_out_ref[...] = cw_ref[...]


def _choose_tile_m(m, f, itemsize, vmem_cap):
    """Tile over M targeting ~VMEM/16 bytes per f_t tile, multiple of 128."""
    target = max(1 << 20, vmem_cap // 16)
    tm = (target // max(1, f * itemsize)) // 128 * 128
    tm = max(128, min(2048, tm))
    return m if m <= tm else tm


def proto_loss(mu_s, f_t, prop, *, nav_t=1.0, s_par=0.5, eps=1e-6, tile_m=None):
    """Forward pass of My_ProtoLoss. Returns (t2p_loss, p2t_loss) as f32 scalars."""
    k, f = mu_s.shape
    m, f2 = f_t.shape
    assert f == f2 and prop.shape == (k, 1)

    # Per-generation VMEM budgeting (v7x: 64 MiB/TC, v5e/v6e: 128 MiB).
    try:
        vmem_cap = int(pltpu.get_tpu_info().vmem_capacity_bytes)
    except Exception:
        vmem_cap = 64 << 20                       # conservative v7x default
    vmem_limit = max(32 << 20, min(vmem_cap * 3 // 4, 96 << 20))

    itemsize = jnp.dtype(f_t.dtype).itemsize
    if tile_m is None:
        tm = _choose_tile_m(m, f, itemsize, vmem_cap)
    else:
        tm = min(int(tile_m), m)
        if tm < m:
            tm = max(8, (tm // 8) * 8)            # block sublane dim must be 8-aligned

    n_tiles = int(pl.cdiv(m, tm))
    n_splits = 2 if n_tiles >= 2 else 1           # dual-TC split of M (v7x); serial elsewhere
    n_per = int(pl.cdiv(n_tiles, n_splits))

    kernel = functools.partial(
        _proto_loss_kernel, nav_t=float(nav_t), eps=float(eps),
        tile_m=tm, tiles_per_core=n_per, total_m=m)

    def ft_index(c, j):
        # Clamp overflow steps (odd tile counts) to a valid tile; the kernel
        # fully masks them so nothing is double counted and no DMA goes OOB.
        return (jnp.minimum(c * n_per + j, n_tiles - 1), 0)

    part_shape = jax.ShapeDtypeStruct((n_splits, k, 1), jnp.float32)
    out_specs = tuple(
        pl.BlockSpec((None, k, 1), lambda c, j: (c, 0, 0)) for _ in range(4))

    bytes_in = (mu_s.size * jnp.dtype(mu_s.dtype).itemsize
                + f_t.size * itemsize
                + prop.size * jnp.dtype(prop.dtype).itemsize)
    cost = pl.CostEstimate(flops=2 * k * m * f + 10 * k * m,
                           transcendentals=2 * k * m,
                           bytes_accessed=bytes_in + 4 * n_splits * k * 4)

    t2p_parts, tmax_p, tsum_p, cw_p = pl.pallas_call(
        kernel,
        out_shape=(part_shape, part_shape, part_shape, part_shape),
        grid_spec=pltpu.PrefetchScalarGridSpec(
            num_scalar_prefetch=0,
            grid=(n_splits, n_per),
            in_specs=[
                pl.BlockSpec((k, f), lambda c, j: (0, 0)),     # mu_s resident
                pl.BlockSpec((tm, f), ft_index),               # f_t tiled over M
                pl.BlockSpec((k, 1), lambda c, j: (0, 0)),     # prop resident
            ],
            out_specs=out_specs,
            scratch_shapes=[pltpu.VMEM((k, 1), jnp.float32)] * 6,
        ),
        compiler_params=pltpu.CompilerParams(
            dimension_semantics=("parallel", "arbitrary"),
            vmem_limit_bytes=int(vmem_limit)),
        cost_estimate=cost,
    )(mu_s, f_t, prop)

    # ---- tiny cross-core merge in plain JAX (K-length log-sum-exp combine) ----
    gmax = jnp.max(tmax_p, axis=0)                       # (K, 1)
    scale = jnp.exp(tmax_p - gmax)                       # (n_splits, K, 1)
    s_tot = jnp.sum(tsum_p * scale, axis=0)              # sum_m exp(logit - gmax)
    c_tot = jnp.sum(cw_p * scale, axis=0)                # sum_m cos * exp(logit - gmax)
    row_cos = c_tot / s_tot                              # sum_m cos * t_dist per class
    prop32 = prop.astype(jnp.float32)
    # cost_mat = 1 - cos folded away using sum_m t_dist = 1, sum_k s_dist = 1.
    p2t = (1.0 - s_par) * (jnp.sum(prop32) - jnp.sum(prop32 * row_cos))
    t2p = s_par * (1.0 - jnp.sum(t2p_parts) / m)
    return t2p, p2t


def proto_loss_ref(mu_s, f_t, prop, *, nav_t=1.0, s_par=0.5, eps=1e-6):
    """Pure-JAX reference mirroring the PyTorch forward."""
    sim_mat = mu_s @ f_t.T
    new_logits = sim_mat / nav_t + jnp.log(prop + eps)
    s_dist = jax.nn.softmax(new_logits, axis=0)
    t_dist = jax.nn.softmax(sim_mat / nav_t, axis=1)
    mu_n = mu_s / jnp.maximum(jnp.linalg.norm(mu_s, axis=1, keepdims=True), 1e-12)
    ft_n = f_t / jnp.maximum(jnp.linalg.norm(f_t, axis=1, keepdims=True), 1e-12)
    cost_mat = 1.0 - mu_n @ ft_n.T
    t2p = (s_par * cost_mat * s_dist).sum(0).mean()
    p2t = (((1.0 - s_par) * cost_mat * t_dist).sum(1) * prop[:, 0]).sum()
    return t2p, p2t


if __name__ == "__main__":
    nav_t, s_par = 1.0, 0.5
    key = jax.random.PRNGKey(0)
    keys = jax.random.split(key, 6)

    def check(K, M, F, tile_m, k_mu, k_ft):
        mu_s = jax.random.normal(k_mu, (K, F), dtype=jnp.float32)
        f_t = jax.random.normal(k_ft, (M, F), dtype=jnp.float32)
        prop = jnp.ones((K, 1), dtype=jnp.float32) / K        # __init__ value
        t2p, p2t = proto_loss(mu_s, f_t, prop, nav_t=nav_t, s_par=s_par,
                              tile_m=tile_m)
        jax.block_until_ready((t2p, p2t))
        t2p_r, p2t_r = proto_loss_ref(mu_s, f_t, prop, nav_t=nav_t, s_par=s_par)
        assert jnp.allclose(t2p, t2p_r, rtol=1e-4, atol=1e-5), (K, M, t2p, t2p_r)
        assert jnp.allclose(p2t, p2t_r, rtol=1e-4, atol=1e-5), (K, M, p2t, p2t_r)

    # Single-tile case: K=8 classes, M=16 target samples, F=32 features.
    check(8, 16, 32, None, keys[0], keys[1])
    # Even multi-tile case: 4 tiles of 16, dual-core split (2 tiles per core).
    check(8, 64, 32, 16, keys[2], keys[3])
    # Ragged case: M=70 with tile 16 -> 5 tiles, padded tail tile on core 0/1
    # and a fully-masked overflow step on core 1 (exercises clamp + masking).
    check(8, 70, 32, 16, keys[4], keys[5])

    print("KERNEL_OK")
</pallas_src>

<mosaic_0001>
module attributes {stable_mosaic.version = 11 : i64} {
  func.func @_proto_loss_kernel(%arg0: i32, %arg1: i32, %arg2: memref<8x32xf32, #tpu.memory_space<vmem>>, %arg3: memref<16x32xf32, #tpu.memory_space<vmem>>, %arg4: memref<8x1xf32, #tpu.memory_space<vmem>>, %arg5: memref<1x8x1xf32, #tpu.memory_space<vmem>>, %arg6: memref<1x8x1xf32, #tpu.memory_space<vmem>>, %arg7: memref<1x8x1xf32, #tpu.memory_space<vmem>>, %arg8: memref<1x8x1xf32, #tpu.memory_space<vmem>>, %arg9: memref<8x1xf32, #tpu.memory_space<vmem>>, %arg10: memref<8x1xf32, #tpu.memory_space<vmem>>, %arg11: memref<8x1xf32, #tpu.memory_space<vmem>>, %arg12: memref<8x1xf32, #tpu.memory_space<vmem>>, %arg13: memref<8x1xf32, #tpu.memory_space<vmem>>, %arg14: memref<8x1xf32, #tpu.memory_space<vmem>>) attributes {dimension_semantics = [#tpu.dimension_semantics<parallel>, #tpu.dimension_semantics<arbitrary>], iteration_bounds = array<i64: 1, 1>, scalar_prefetch = 0 : i64, scratch_operands = 6 : i64, tpu.core_type = #tpu.core_type<tc>, window_params = [{pipeline_mode = #tpu.pipeline_mode<synchronous>, transform_indices = @transform_0, window_bounds = array<i64: 8, 32>}, {transform_indices = @transform_1, window_bounds = array<i64: 16, 32>}, {pipeline_mode = #tpu.pipeline_mode<synchronous>, transform_indices = @transform_2, window_bounds = array<i64: 8, 1>}, {transform_indices = @transform_3, window_bounds = array<i64: 1, 8, 1>}, {transform_indices = @transform_4, window_bounds = array<i64: 1, 8, 1>}, {transform_indices = @transform_5, window_bounds = array<i64: 1, 8, 1>}, {transform_indices = @transform_6, window_bounds = array<i64: 1, 8, 1>}]} {
    %c0_i32 = arith.constant 0 : i32
    %0 = arith.cmpi eq, %arg1, %c0_i32 : i32
    %1 = arith.extui %0 : i1 to i32
    %c0_i32_0 = arith.constant 0 : i32
    %2 = arith.cmpi ne, %1, %c0_i32_0 : i32
    scf.if %2 {
      %c0_39 = arith.constant 0 : index
      %c0_40 = arith.constant 0 : index
      %83 = vector.load %arg2[%c0_39, %c0_40] : memref<8x32xf32, #tpu.memory_space<vmem>>, vector<8x32xf32>
      %84 = arith.mulf %83, %83 : vector<8x32xf32>
      %cst_41 = arith.constant dense<0.000000e+00> : vector<8xf32>
      %85 = vector.multi_reduction <add>, %84, %cst_41 [1] : vector<8x32xf32> to vector<8xf32>
      %86 = vector.shape_cast %85 : vector<8xf32> to vector<8x1xf32>
      %cst_42 = arith.constant 1.000000e-24 : f32
      %87 = vector.broadcast %cst_42 : f32 to vector<8x1xf32>
      %88 = arith.maximumf %86, %87 : vector<8x1xf32>
      %89 = math.rsqrt %88 : vector<8x1xf32>
      %c0_43 = arith.constant 0 : index
      %c0_44 = arith.constant 0 : index
      %90 = vector.load %arg9[%c0_43, %c0_44] : memref<8x1xf32, #tpu.memory_space<vmem>>, vector<8x1xf32>
      tpu.vector_store %arg9[%c0_43, %c0_44], %89 {strides = array<i32>} : memref<8x1xf32, #tpu.memory_space<vmem>>, vector<8x1xf32>,
      %c0_45 = arith.constant 0 : index
      %c0_46 = arith.constant 0 : index
      %91 = vector.load %arg4[%c0_45, %c0_46] : memref<8x1xf32, #tpu.memory_space<vmem>>, vector<8x1xf32>
      %cst_47 = arith.constant 9.99999997E-7 : f32
      %92 = vector.broadcast %cst_47 : f32 to vector<8x1xf32>
      %93 = arith.addf %91, %92 : vector<8x1xf32>
      %94 = math.log %93 : vector<8x1xf32>
      %c0_48 = arith.constant 0 : index
      %c0_49 = arith.constant 0 : index
      %95 = vector.load %arg10[%c0_48, %c0_49] : memref<8x1xf32, #tpu.memory_space<vmem>>, vector<8x1xf32>
      tpu.vector_store %arg10[%c0_48, %c0_49], %94 {strides = array<i32>} : memref<8x1xf32, #tpu.memory_space<vmem>>, vector<8x1xf32>,
      %cst_50 = arith.constant 0xFF800000 : f32
      %96 = vector.broadcast %cst_50 : f32 to vector<8x1xf32>
      %c0_51 = arith.constant 0 : index
      %c0_52 = arith.constant 0 : index
      %97 = vector.load %arg11[%c0_51, %c0_52] : memref<8x1xf32, #tpu.memory_space<vmem>>, vector<8x1xf32>
      tpu.vector_store %arg11[%c0_51, %c0_52], %96 {strides = array<i32>} : memref<8x1xf32, #tpu.memory_space<vmem>>, vector<8x1xf32>,
      %cst_53 = arith.constant 0.000000e+00 : f32
      %98 = vector.broadcast %cst_53 : f32 to vector<8x1xf32>
      %c0_54 = arith.constant 0 : index
      %c0_55 = arith.constant 0 : index
      %99 = vector.load %arg12[%c0_54, %c0_55] : memref<8x1xf32, #tpu.memory_space<vmem>>, vector<8x1xf32>
      tpu.vector_store %arg12[%c0_54, %c0_55], %98 {strides = array<i32>} : memref<8x1xf32, #tpu.memory_space<vmem>>, vector<8x1xf32>,
      %cst_56 = arith.constant 0.000000e+00 : f32
      %100 = vector.broadcast %cst_56 : f32 to vector<8x1xf32>
      %c0_57 = arith.constant 0 : index
      %c0_58 = arith.constant 0 : index
      %101 = vector.load %arg13[%c0_57, %c0_58] : memref<8x1xf32, #tpu.memory_space<vmem>>, vector<8x1xf32>
      tpu.vector_store %arg13[%c0_57, %c0_58], %100 {strides = array<i32>} : memref<8x1xf32, #tpu.memory_space<vmem>>, vector<8x1xf32>,
      %cst_59 = arith.constant 0.000000e+00 : f32
      %102 = vector.broadcast %cst_59 : f32 to vector<8x1xf32>
      %c0_60 = arith.constant 0 : index
      %c0_61 = arith.constant 0 : index
      %103 = vector.load %arg14[%c0_60, %c0_61] : memref<8x1xf32, #tpu.memory_space<vmem>>, vector<8x1xf32>
      tpu.vector_store %arg14[%c0_60, %c0_61], %102 {strides = array<i32>} : memref<8x1xf32, #tpu.memory_space<vmem>>, vector<8x1xf32>,
    } else {
    }
    %c0 = arith.constant 0 : index
    %c0_1 = arith.constant 0 : index
    %3 = vector.load %arg2[%c0, %c0_1] : memref<8x32xf32, #tpu.memory_space<vmem>>, vector<8x32xf32>
    %c0_2 = arith.constant 0 : index
    %c0_3 = arith.constant 0 : index
    %4 = vector.load %arg3[%c0_2, %c0_3] : memref<16x32xf32, #tpu.memory_space<vmem>>, vector<16x32xf32>
    %c1_i32 = arith.constant 1 : i32
    %5 = arith.muli %arg0, %c1_i32 : i32
    %6 = arith.addi %5, %arg1 : i32
    %c16_i32 = arith.constant 16 : i32
    %7 = arith.muli %6, %c16_i32 : i32
    %c16_i32_4 = arith.constant 16 : i32
    %8 = arith.subi %c16_i32_4, %7 : i32
    %9 = tpu.iota {dimensions = array<i32: 1>} : vector<1x16xi32>
    %10 = vector.broadcast %8 : i32 to vector<1x16xi32>
    %11 = arith.cmpi slt, %9, %10 : vector<1x16xi32>
    %12 = arith.extui %11 : vector<1x16xi1> to vector<1x16xi32>
    %13 = arith.sitofp %12 : vector<1x16xi32> to vector<1x16xf32>
    %14 = tpu.iota {dimensions = array<i32: 0>} : vector<16x1xi32>
    %15 = vector.broadcast %8 : i32 to vector<16x1xi32>
    %16 = arith.cmpi slt, %14, %15 : vector<16x1xi32>
    %cst = arith.constant dense<0.000000e+00> : vector<8x16xf32>
    %17 = tpu.matmul %3, %4, %cst {dimension_numbers = #tpu.dot_dimension_numbers<[1], [1], [0], [0], [0, 0, 1, 0], [], []>} : vector<8x32xf32>, vector<16x32xf32>, vector<8x16xf32> -> vector<8x16xf32>
    %cst_5 = arith.constant 0.000000e+00 : f32
    %18 = vector.shape_cast %11 : vector<1x16xi1> to vector<1x16xi1>
    %19 = vector.broadcast %18 : vector<1x16xi1> to vector<8x16xi1>
    %20 = vector.broadcast %cst_5 : f32 to vector<8x16xf32>
    %21 = arith.select %19, %17, %20 : vector<8x16xi1>, vector<8x16xf32>
    %22 = arith.mulf %4, %4 : vector<16x32xf32>
    %cst_6 = arith.constant dense<0.000000e+00> : vector<16xf32>
    %23 = vector.multi_reduction <add>, %22, %cst_6 [1] : vector<16x32xf32> to vector<16xf32>
    %24 = vector.shape_cast %23 : vector<16xf32> to vector<16x1xf32>
    %cst_7 = arith.constant 1.000000e-24 : f32
    %25 = vector.broadcast %cst_7 : f32 to vector<16x1xf32>
    %26 = arith.maximumf %24, %25 : vector<16x1xf32>
    %27 = math.rsqrt %26 : vector<16x1xf32>
    %cst_8 = arith.constant 0.000000e+00 : f32
    %28 = vector.broadcast %cst_8 : f32 to vector<16x1xf32>
    %29 = arith.select %16, %27, %28 : vector<16x1xi1>, vector<16x1xf32>
    %c0_9 = arith.constant 0 : index
    %c0_10 = arith.constant 0 : index
    %30 = vector.load %arg9[%c0_9, %c0_10] : memref<8x1xf32, #tpu.memory_space<vmem>>, vector<8x1xf32>
    %31 = vector.broadcast %30 : vector<8x1xf32> to vector<8x16xf32>
    %32 = arith.mulf %21, %31 : vector<8x16xf32>
    %cst_11 = arith.constant 1.000000e+00 : f32
    %33 = vector.broadcast %cst_11 : f32 to vector<8x16xf32>
    %34 = arith.mulf %21, %33 : vector<8x16xf32>
    %c0_12 = arith.constant 0 : index
    %c0_13 = arith.constant 0 : index
    %35 = vector.load %arg10[%c0_12, %c0_13] : memref<8x1xf32, #tpu.memory_space<vmem>>, vector<8x1xf32>
    %36 = vector.broadcast %35 : vector<8x1xf32> to vector<8x16xf32>
    %37 = arith.addf %34, %36 : vector<8x16xf32>
    %cst_14 = arith.constant dense<0xFF800000> : vector<16xf32>
    %38 = vector.multi_reduction <maximumf>, %37, %cst_14 [0] : vector<8x16xf32> to vector<16xf32>
    %39 = vector.shape_cast %38 : vector<16xf32> to vector<1x16xf32>
    %40 = vector.broadcast %39 : vector<1x16xf32> to vector<8x16xf32>
    %41 = arith.subf %37, %40 : vector<8x16xf32>
    %42 = math.exp %41 : vector<8x16xf32>
    %cst_15 = arith.constant dense<0.000000e+00> : vector<16xf32>
    %43 = vector.multi_reduction <add>, %42, %cst_15 [0] : vector<8x16xf32> to vector<16xf32>
    %44 = vector.shape_cast %43 : vector<16xf32> to vector<1x16xf32>
    %45 = tpu.reciprocal %44 : vector<1x16xf32> -> vector<1x16xf32>
    %46 = vector.broadcast %45 : vector<1x16xf32> to vector<8x16xf32>
    %47 = arith.mulf %42, %46 : vector<8x16xf32>
    %cst_16 = arith.constant dense<0xFF800000> : vector<8xf32>
    %48 = vector.multi_reduction <maximumf>, %34, %cst_16 [1] : vector<8x16xf32> to vector<8xf32>
    %49 = vector.shape_cast %48 : vector<8xf32> to vector<8x1xf32>
    %c0_17 = arith.constant 0 : index
    %c0_18 = arith.constant 0 : index
    %50 = vector.load %arg11[%c0_17, %c0_18] : memref<8x1xf32, #tpu.memory_space<vmem>>, vector<8x1xf32>
    %51 = arith.maximumf %50, %49 : vector<8x1xf32>
    %c0_19 = arith.constant 0 : index
    %c0_20 = arith.constant 0 : index
    %52 = vector.load %arg11[%c0_19, %c0_20] : memref<8x1xf32, #tpu.memory_space<vmem>>, vector<8x1xf32>
    %53 = arith.subf %52, %51 : vector<8x1xf32>
    %54 = math.exp %53 : vector<8x1xf32>
    %55 = vector.broadcast %51 : vector<8x1xf32> to vector<8x16xf32>
    %56 = arith.subf %34, %55 : vector<8x16xf32>
    %57 = math.exp %56 : vector<8x16xf32>
    %58 = vector.broadcast %13 : vector<1x16xf32> to vector<8x16xf32>
    %59 = arith.mulf %57, %58 : vector<8x16xf32>
    %c0_21 = arith.constant 0 : index
    %c0_22 = arith.constant 0 : index
    %60 = vector.load %arg12[%c0_21, %c0_22] : memref<8x1xf32, #tpu.memory_space<vmem>>, vector<8x1xf32>
    %61 = arith.mulf %54, %60 : vector<8x1xf32>
    %cst_23 = arith.constant dense<0.000000e+00> : vector<8xf32>
    %62 = vector.multi_reduction <add>, %59, %cst_23 [1] : vector<8x16xf32> to vector<8xf32>
    %63 = vector.shape_cast %62 : vector<8xf32> to vector<8x1xf32>
    %64 = arith.addf %61, %63 : vector<8x1xf32>
    %c0_24 = arith.constant 0 : index
    %c0_25 = arith.constant 0 : index
    %65 = vector.load %arg12[%c0_24, %c0_25] : memref<8x1xf32, #tpu.memory_space<vmem>>, vector<8x1xf32>
    tpu.vector_store %arg12[%c0_24, %c0_25], %64 {strides = array<i32>} : memref<8x1xf32, #tpu.memory_space<vmem>>, vector<8x1xf32>,
    %c0_26 = arith.constant 0 : index
    %c0_27 = arith.constant 0 : index
    %66 = vector.load %arg11[%c0_26, %c0_27] : memref<8x1xf32, #tpu.memory_space<vmem>>, vector<8x1xf32>
    tpu.vector_store %arg11[%c0_26, %c0_27], %51 {strides = array<i32>} : memref<8x1xf32, #tpu.memory_space<vmem>>, vector<8x1xf32>,
    %67 = arith.mulf %32, %47 : vector<8x16xf32>
    %68 = arith.mulf %32, %59 : vector<8x16xf32>
    %69 = tpu.concatenate %67, %68 in 0 : vector<8x16xf32>, vector<8x16xf32> -> vector<16x16xf32>
    %cst_28 = arith.constant dense<0.000000e+00> : vector<16x1xf32>
    %70 = tpu.matmul %69, %29, %cst_28 {dimension_numbers = #tpu.dot_dimension_numbers<[1], [0], [0], [1], [0, 0, 1, 1], [], []>} : vector<16x16xf32>, vector<16x1xf32>, vector<16x1xf32> -> vector<16x1xf32>
    %c0_29 = arith.constant 0 : index
    %c0_30 = arith.constant 0 : index
    %71 = vector.load %arg14[%c0_29, %c0_30] : memref<8x1xf32, #tpu.memory_space<vmem>>, vector<8x1xf32>
    %72 = vector.extract_strided_slice %70 {offsets = [0, 0], sizes = [8, 1], strides = [1, 1]} : vector<16x1xf32> to vector<8x1xf32>
    %73 = arith.addf %71, %72 : vector<8x1xf32>
    %c0_31 = arith.constant 0 : index
    %c0_32 = arith.constant 0 : index
    %74 = vector.load %arg14[%c0_31, %c0_32] : memref<8x1xf32, #tpu.memory_space<vmem>>, vector<8x1xf32>
    tpu.vector_store %arg14[%c0_31, %c0_32], %73 {strides = array<i32>} : memref<8x1xf32, #tpu.memory_space<vmem>>, vector<8x1xf32>,
    %c0_33 = arith.constant 0 : index
    %c0_34 = arith.constant 0 : index
    %75 = vector.load %arg13[%c0_33, %c0_34] : memref<8x1xf32, #tpu.memory_space<vmem>>, vector<8x1xf32>
    %76 = arith.mulf %54, %75 : vector<8x1xf32>
    %77 = vector.extract_strided_slice %70 {offsets = [8, 0], sizes = [8, 1], strides = [1, 1]} : vector<16x1xf32> to vector<8x1xf32>
    %78 = arith.addf %76, %77 : vector<8x1xf32>
    %c0_35 = arith.constant 0 : index
    %c0_36 = arith.constant 0 : index
    %79 = vector.load %arg13[%c0_35, %c0_36] : memref<8x1xf32, #tpu.memory_space<vmem>>, vector<8x1xf32>
    tpu.vector_store %arg13[%c0_35, %c0_36], %78 {strides = array<i32>} : memref<8x1xf32, #tpu.memory_space<vmem>>, vector<8x1xf32>,
    %c0_i32_37 = arith.constant 0 : i32
    %80 = arith.cmpi eq, %arg1, %c0_i32_37 : i32
    %81 = arith.extui %80 : i1 to i32
    %c0_i32_38 = arith.constant 0 : i32
    %82 = arith.cmpi ne, %81, %c0_i32_38 : i32
    scf.if %82 {
      %c0_39 = arith.constant 0 : index
      %c0_40 = arith.constant 0 : index
      %83 = vector.load %arg14[%c0_39, %c0_40] : memref<8x1xf32, #tpu.memory_space<vmem>>, vector<8x1xf32>
      %c0_41 = arith.constant 0 : index
      %c0_42 = arith.constant 0 : index
      %c0_43 = arith.constant 0 : index
      %84 = vector.load %arg5[%c0_41, %c0_42, %c0_43] : memref<1x8x1xf32, #tpu.memory_space<vmem>>, vector<1x8x1xf32>
      %85 = vector.shape_cast %84 : vector<1x8x1xf32> to vector<8x1xf32>
      %86 = vector.shape_cast %83 : vector<8x1xf32> to vector<1x8x1xf32>
      tpu.vector_store %arg5[%c0_41, %c0_42, %c0_43], %86 {strides = array<i32>} : memref<1x8x1xf32, #tpu.memory_space<vmem>>, vector<1x8x1xf32>,
      %c0_44 = arith.constant 0 : index
      %c0_45 = arith.constant 0 : index
      %87 = vector.load %arg11[%c0_44, %c0_45] : memref<8x1xf32, #tpu.memory_space<vmem>>, vector<8x1xf32>
      %c0_46 = arith.constant 0 : index
      %c0_47 = arith.constant 0 : index
      %c0_48 = arith.constant 0 : index
      %88 = vector.load %arg6[%c0_46, %c0_47, %c0_48] : memref<1x8x1xf32, #tpu.memory_space<vmem>>, vector<1x8x1xf32>
      %89 = vector.shape_cast %88 : vector<1x8x1xf32> to vector<8x1xf32>
      %90 = vector.shape_cast %87 : vector<8x1xf32> to vector<1x8x1xf32>
      tpu.vector_store %arg6[%c0_46, %c0_47, %c0_48], %90 {strides = array<i32>} : memref<1x8x1xf32, #tpu.memory_space<vmem>>, vector<1x8x1xf32>,
      %c0_49 = arith.constant 0 : index
      %c0_50 = arith.constant 0 : index
      %91 = vector.load %arg12[%c0_49, %c0_50] : memref<8x1xf32, #tpu.memory_space<vmem>>, vector<8x1xf32>
      %c0_51 = arith.constant 0 : index
      %c0_52 = arith.constant 0 : index
      %c0_53 = arith.constant 0 : index
      %92 = vector.load %arg7[%c0_51, %c0_52, %c0_53] : memref<1x8x1xf32, #tpu.memory_space<vmem>>, vector<1x8x1xf32>
      %93 = vector.shape_cast %92 : vector<1x8x1xf32> to vector<8x1xf32>
      %94 = vector.shape_cast %91 : vector<8x1xf32> to vector<1x8x1xf32>
      tpu.vector_store %arg7[%c0_51, %c0_52, %c0_53], %94 {strides = array<i32>} : memref<1x8x1xf32, #tpu.memory_space<vmem>>, vector<1x8x1xf32>,
      %c0_54 = arith.constant 0 : index
      %c0_55 = arith.constant 0 : index
      %95 = vector.load %arg13[%c0_54, %c0_55] : memref<8x1xf32, #tpu.memory_space<vmem>>, vector<8x1xf32>
      %c0_56 = arith.constant 0 : index
      %c0_57 = arith.constant 0 : index
      %c0_58 = arith.constant 0 : index
      %96 = vector.load %arg8[%c0_56, %c0_57, %c0_58] : memref<1x8x1xf32, #tpu.memory_space<vmem>>, vector<1x8x1xf32>
      %97 = vector.shape_cast %96 : vector<1x8x1xf32> to vector<8x1xf32>
      %98 = vector.shape_cast %95 : vector<8x1xf32> to vector<1x8x1xf32>
      tpu.vector_store %arg8[%c0_56, %c0_57, %c0_58], %98 {strides = array<i32>} : memref<1x8x1xf32, #tpu.memory_space<vmem>>, vector<1x8x1xf32>,
    } else {
    }
    return
  }
  func.func @transform_0(%arg0: i32, %arg1: i32) -> (i32, i32) {
    %c0_i32 = arith.constant 0 : i32
    %c0_i32_0 = arith.constant 0 : i32
    %c0_i32_1 = arith.constant 0 : i32
    return %c0_i32, %c0_i32_0 : i32, i32
  }
  func.func @transform_1(%arg0: i32, %arg1: i32) -> (i32, i32) {
    %c1_i32 = arith.constant 1 : i32
    %0 = arith.muli %arg0, %c1_i32 : i32
    %1 = arith.addi %0, %arg1 : i32
    %c0_i32 = arith.constant 0 : i32
    %2 = arith.minsi %1, %c0_i32 : i32
    %c0_i32_0 = arith.constant 0 : i32
    %c0_i32_1 = arith.constant 0 : i32
    return %2, %c0_i32_0 : i32, i32
  }
  func.func @transform_2(%arg0: i32, %arg1: i32) -> (i32, i32) {
    %c0_i32 = arith.constant 0 : i32
    %c0_i32_0 = arith.constant 0 : i32
    %c0_i32_1 = arith.constant 0 : i32
    return %c0_i32, %c0_i32_0 : i32, i32
  }
  func.func @transform_3(%arg0: i32, %arg1: i32) -> (i32, i32, i32) {
    %c0_i32 = arith.constant 0 : i32
    %c0_i32_0 = arith.constant 0 : i32
    %c0_i32_1 = arith.constant 0 : i32
    return %arg0, %c0_i32, %c0_i32_0 : i32, i32, i32
  }
  func.func @transform_4(%arg0: i32, %arg1: i32) -> (i32, i32, i32) {
    %c0_i32 = arith.constant 0 : i32
    %c0_i32_0 = arith.constant 0 : i32
    %c0_i32_1 = arith.constant 0 : i32
    return %arg0, %c0_i32, %c0_i32_0 : i32, i32, i32
  }
  func.func @transform_5(%arg0: i32, %arg1: i32) -> (i32, i32, i32) {
    %c0_i32 = arith.constant 0 : i32
    %c0_i32_0 = arith.constant 0 : i32
    %c0_i32_1 = arith.constant 0 : i32
    return %arg0, %c0_i32, %c0_i32_0 : i32, i32, i32
  }
  func.func @transform_6(%arg0: i32, %arg1: i32) -> (i32, i32, i32) {
    %c0_i32 = arith.constant 0 : i32
    %c0_i32_0 = arith.constant 0 : i32
    %c0_i32_1 = arith.constant 0 : i32
    return %arg0, %c0_i32, %c0_i32_0 : i32, i32, i32
  }
}

</mosaic_0001>

<bundles_post_ra>
// kernel: tpu_custom_call.1
= control target key start
LH: loop header
LB: loop body
LE: loop exit
PB: predicated region body
PF: predicated region fallthrough
CT: control target
= control target key end

     0   :  { %12 = vsyncpa [#allocation9], 0  ;;  %s357_s24 = smov [#allocation8]   ;;  %s358_s26 = smov 128   ;;  %s456_s0 = inlined_call_operand.vmem [shape: f32[8,32], index: 0, kind: input, shape index: {}]   ;;  %s457_s1 = inlined_call_operand.hbm [shape: f32[16,32], index: 1, kind: input, shape index: {}]   ;;  %s458_s2 = inlined_call_operand.vmem [shape: f32[8,1], index: 2, kind: input, shape index: {}]   ;;  %s459_s3 = inlined_call_operand.vmem [shape: f32[1,8,1], index: 3, kind: output, shape index: {0}]   ;;  %s460_s4 = inlined_call_operand.vmem [shape: f32[1,8,1], index: 4, kind: output, shape index: {1}]   ;;  %s461_s5 = inlined_call_operand.vmem [shape: f32[1,8,1], index: 5, kind: output, shape index: {2}]   ;;  %s462_s6 = inlined_call_operand.vmem [shape: f32[1,8,1], index: 6, kind: output, shape index: {3}]  }
   0x1   :  { %s25_s23 = sshll.u32 %s457_s1, 4  ;;  %s27_s25 = sshll.u32 %s357_s24, 4  ;;  %s26_s23 = int_to_ptr.hbm [resolvable:$true] %s25_s23  ;;  %s28_s25 = int_to_ptr.vmem [resolvable:$true] %s27_s25 }
   0x2   :  { %s359_s27 = smov 8  }
   0x3   :  { %33 = dma.hbm_to_vmem [thread:$0]  %s26_s23, 256, %s28_s25, [#allocation9], %s358_s26, %s358_s26, %s359_s27  }
   0x4   :  { %355 = dma.done.wait [#allocation9], 256  }
   0x5   :  { %356 = vsyncadd [#allocation9], 4294967040  ;;  %v360_v0 = vmov 0   ;;  %vm50_vm0 = vcmask 261120   ;;  %v78_v1 = vld [vmem:[#allocation8 + $0x8] sm:$0xff]  ;;  %v76_v2 = vld [vmem:[%s456_s0] sm:$0xff]  ;;  %v82_v12 = vlaneseq }
   0x6   :  { %312 = vset.pattern.permute.xlu1 %v360_v0  ;;  %314 = vset.pattern.permute.xlu0 %v360_v0  ;;  %v49_v3 = vmul.f32 %v76_v2, %v76_v2  ;;  %v67_v4 = vld [vmem:[%s458_s2] sm:$0xff]  ;;  %v77_v5 = vld [vmem:[#allocation8] sm:$0xff]  ;;  %vm65_vm1 = vcmask 7168   ;;  %v126_v11 = vmul.f32 %v78_v1, %v78_v1  ;;  %v361_v17 = vmov 0.0  }
   0x7   :  { %313 = vset.pattern.permute.xlu2 %v360_v0  ;;  %299 = vmatpush.xpose.msk.msra.mxu0 %vm50_vm0, %v78_v1  ;;  %v68_v6 = vadd.f32 1e-06, %v67_v4  ;;  %v83_v13 = vand.u32 127, %v82_v12  ;;  %v125_v15 = vmul.f32 %v77_v5, %v77_v5  ;;  %73 = vst.msk [vmem:[#allocation5] sm:$0xff] %vm65_vm1, %v361_v17  ;;  %vm171_vm3 = vcmask 130048  }
   0x8   :  { %v51_v7 = vsel %vm50_vm0, %v49_v3, 0.0  ;;  %v130_v14 = vsel %vm50_vm0, %v126_v11, 0.0  ;;  %74 = vst.msk [vmem:[#allocation6] sm:$0xff] %vm65_vm1, %v361_v17  ;;  %v362_v43 = vmov -inf  }
   0x9   :  { %52 = vadd.xlane.f32.xlu0 %v51_v7  ;;  %315 = vlog2.f32 %v68_v6  ;;  %v127_v16 = vsel %vm50_vm0, %v125_v15, 0.0  ;;  %vm85_vm2 = vcmp.lt.s32.totalorder %v83_v13, 16  ;;  %75 = vst.msk [vmem:[#allocation7] sm:$0xff] %vm65_vm1, %v361_v17 }
   0xa   :  { %128 = vadd.xlane.f32.xlu2 %v127_v16  ;;  %v416_v18 = vsel %vm85_vm2, 1.0, %v361_v17  ;;  %72 = vst.msk [vmem:[#allocation4] sm:$0xff] %vm65_vm1, %v362_v43 }
   0xb   :  { %300 = vmatpush.xpose.msk.msra.mxu0 %vm50_vm0, %v77_v5 }
   0xe   :  { %301 = vmatmul.msk.f32.vlgmr.msra.gmra.mxu0 %vm50_vm0, %v76_v2 }
   0xf   :  { %v316_v8 = vpop.eup %315  ;;  %v264_v43 = vld [vmem:[#allocation6] sm:$0xff] }
  0x10   :  { %v70_v9 = vmul.f32 0.6931472, %v316_v8 }
  0x11   :  { %v207_v7 = vld [vmem:[#allocation4] sm:$0xff] }
  0x12   :  { %71 = vst.msk [vmem:[#allocation3] sm:$0xff] %vm65_vm1, %v70_v9 }
  0x19   :  { %v164_v10 = vld [vmem:[#allocation3] sm:$0xff] }
  0x1a   :  { %167 = vperm.xlu1 %312, %v164_v10  }
  0x44   :  { %131 = vadd.xlane.f32.xlu1 %v130_v14 }
  0x7c   :  { %v53_v19 = vpop.xlane.xlu0 %52 }
  0x7d   :  { %v54_v20 = vmax.f32 %v53_v19, 1e-24  ;;  %v129_v50 = vpop.xlane.xlu2 %128 }
  0x7e   :  { %v133_v52 = vmax.f32 %v129_v50, 1e-24 }
  0x7f   :  { %317 = vrsqrt.f32 %v54_v20  ;;  %vm61_vm4 = vweird.f32 %v54_v20 }
  0x80   :  { %vm141_vm10 = vweird.f32 %v133_v52 }
  0x85   :  { %v318_v21 = vpop.eup %317 }
  0x86   :  { %v56_v22 = vmul.f32 %v318_v21, %v54_v20  ;;  %vm62_vm5 = vweird.f32 %v318_v21 }
  0x87   :  { %vm63_vm6 = vmor %vm61_vm4, %vm62_vm5 }
  0x88   :  { %v57_v23 = vmul.f32 %v318_v21, %v56_v22 }
  0x8a   :  { %v58_v24 = vmul.f32 0.5, %v57_v23 }
  0x8b   :  { %v120_v25 = vpop.f32.mrf.mxu0 }
  0x8c   :  { %v421_v26 = vsel %vm85_vm2, %v120_v25, 0.0  ;;  %v59_v27 = vsub.f32 1.5, %v58_v24  ;;  %v168_v32 = vpop.permute.xlu1 %167 }
  0x8d   :  { %v204_v28 = vsel %vm171_vm3, %v421_v26, -inf  ;;  %v170_v33 = vadd.f32 %v168_v32, %v421_v26 }
  0x8e   :  { %205 = vmax.xlane.f32.xlu0 %v204_v28  ;;  %v60_v29 = vmul.f32 %v318_v21, %v59_v27 }
  0x8f   :  { %v172_v34 = vsel %vm171_vm3, %v170_v33, -inf }
  0x90   :  { %v64_v30 = vsel %vm63_vm6, %v318_v21, %v60_v29  ;;  %v173_v35 = vrot.slane %v172_v34, 4 }
  0x91   :  { %66 = vst.msk [vmem:[#allocation2] sm:$0xff] %vm65_vm1, %v64_v30 }
  0x92   :  { %v174_v36 = vmax.f32 %v172_v34, %v173_v35  ;;  %v261_v34 = vld [vmem:[#allocation7] sm:$0xff] }
  0x94   :  { %v175_v37 = vrot.slane %v174_v36, 2 }
  0x96   :  { %v176_v38 = vmax.f32 %v174_v36, %v175_v37 }
  0x98   :  { %v157_v31 = vld [vmem:[#allocation2] sm:$0xff]  ;;  %v177_v39 = vrot.slane %v176_v38, 1 }
  0x9a   :  { %v178_v40 = vmax.f32 %v176_v38, %v177_v39  ;;  %v221_v38 = vld [vmem:[#allocation5] sm:$0xff] }
  0x9c   :  { %v179_v41 = vsub.f32 %v170_v33, %v178_v40 }
  0x9e   :  { %v180_v42 = vmul.f32 1.442695, %v179_v41 }
  0xa0   :  { %319 = vpow2.f32 %v180_v42 }
  0xa2   :  { %160 = vperm.xlu0 %314, %v157_v31  }
  0xa6   :  { %v320_v44 = vpop.eup %319 }
  0xa7   :  { %v182_v45 = vsel %vm171_vm3, %v320_v44, 0.0 }
  0xa8   :  { %v183_v46 = vrot.slane %v182_v45, 4 }
  0xaa   :  { %v184_v47 = vadd.f32 %v183_v46, %v182_v45 }
  0xac   :  { %v185_v51 = vrot.slane %v184_v47, 2 }
  0xae   :  { %v186_v53 = vadd.f32 %v185_v51, %v184_v47 }
  0xb0   :  { %v187_v57 = vrot.slane %v186_v53, 1 }
  0xb2   :  { %v188_v62 = vadd.f32 %v187_v57, %v186_v53 }
  0xb4   :  { %v200_v16 = vand.u32 2147483648, %v188_v62  ;;  %vm194_vm14 = vweird.f32 %v188_v62  ;;  %v198_v17 = vand.u32 2147483647, %v188_v62 }
  0xb6   :  { %v201_v20 = vor.u32 1.1754944e-38, %v200_v16  ;;  %vm199_vm0 = vcmp.eq.f32.partialorder %v198_v17, 8.507059e+37 }
  0xb7   :  { %v132_v48 = vpop.xlane.xlu1 %131 }
  0xb8   :  { %v134_v49 = vmax.f32 %v132_v48, 1e-24 }
  0xba   :  { %321 = vrsqrt.f32 %v134_v49  ;;  %vm151_vm7 = vweird.f32 %v134_v49 }
  0xbb   :  { %323 = vrsqrt.f32 %v133_v52 }
  0xbc   :  { %325 = vrcp.f32 %v188_v62 }
  0xc0   :  { %v322_v54 = vpop.eup %321 }
  0xc1   :  { %v146_v55 = vmul.f32 %v322_v54, %v134_v49  ;;  %v324_v56 = vpop.eup %323  ;;  %vm152_vm8 = vweird.f32 %v322_v54 }
  0xc2   :  { %v136_v59 = vmul.f32 %v324_v56, %v133_v52  ;;  %vm153_vm9 = vmor %vm151_vm7, %vm152_vm8  ;;  %vm142_vm11 = vweird.f32 %v324_v56  ;;  %v326_v6 = vpop.eup %325 }
  0xc3   :  { %v147_v58 = vmul.f32 %v322_v54, %v146_v55  ;;  %vm143_vm12 = vmor %vm141_vm10, %vm142_vm11  ;;  %v190_v8 = vmul.f32 %v326_v6, %v188_v62  ;;  %vm195_vm13 = vweird.f32 %v326_v6 }
  0xc4   :  { %v137_v61 = vmul.f32 %v324_v56, %v136_v59  ;;  %vm196_vm15 = vmor %vm194_vm14, %vm195_vm13 }
  0xc5   :  { %v148_v60 = vmul.f32 0.5, %v147_v58  ;;  %v191_v11 = vsub.f32 1.0, %v190_v8 }
  0xc6   :  { %v138_v0 = vmul.f32 0.5, %v137_v61 }
  0xc7   :  { %v149_v63 = vsub.f32 1.5, %v148_v60  ;;  %v192_v13 = vmul.f32 %v326_v6, %v191_v11 }
  0xc8   :  { %v139_v2 = vsub.f32 1.5, %v138_v0 }
  0xc9   :  { %v150_v1 = vmul.f32 %v322_v54, %v149_v63  ;;  %v193_v15 = vadd.f32 %v326_v6, %v192_v13 }
  0xca   :  { %v140_v4 = vmul.f32 %v324_v56, %v139_v2 }
  0xcb   :  { %v154_v3 = vsel %vm153_vm9, %v322_v54, %v150_v1  ;;  %v197_v19 = vsel %vm196_vm15, %v326_v6, %v193_v15 }
  0xcc   :  { %252 = vmatpush.msra.mxu1 %v154_v3  ;;  %304 = vmatpush.msra.mxu2 %v154_v3  ;;  %v144_v5 = vsel %vm143_vm12, %v324_v56, %v140_v4  ;;  %v202_v21 = vsel %vm199_vm0, %v201_v20, %v197_v19 }
  0xcd   :  { %v203_v23 = vmul.f32 %v320_v44, %v202_v21 }
  0xce   :  { %253 = vmatpush.msra.mxu1 %v144_v5  ;;  %305 = vmatpush.msra.mxu2 %v144_v5 }
 0x101   :  { %v206_v9 = vpop.xlane.xlu0 %205 }
 0x102   :  { %v208_v10 = vmax.f32 %v207_v7, %v206_v9 }
 0x104   :  { %v209_v12 = vsub.f32 %v207_v7, %v208_v10  ;;  %229 = vst.msk [vmem:[#allocation4] sm:$0xff] %vm65_vm1, %v208_v10  ;;  %214 = vperm.xlu2 %313, %v208_v10  }
 0x10b   :  { %v273_v14 = vld [vmem:[#allocation4] sm:$0xff] }
 0x10c   :  { %274 = vst.msk [vmem:[%s460_s4] sm:$0xff] %vm65_vm1, %v273_v14 }
 0x114   :  { %v161_v22 = vpop.permute.xlu0 %160 }
 0x115   :  { %v163_v24 = vmul.f32 %v161_v22, %v421_v26 }
 0x117   :  { %v230_v25 = vmul.f32 %v203_v23, %v163_v24 }
 0x119   :  { %302 = vmatmul.msk.f32.vlgmr.msra.gmra.mxu1 %vm171_vm3, %v230_v25 }
 0x15e   :  { %v215_v27 = vpop.permute.xlu2 %214 }
 0x15f   :  { %v217_v28 = vsub.f32 %v421_v26, %v215_v27  ;;  %v210_v26 = vmul.f32 1.442695, %v209_v12 }
 0x161   :  { %v218_v29 = vmul.f32 1.442695, %v217_v28 }
 0x163   :  { %327 = vpow2.f32 %v218_v29 }
 0x164   :  { %329 = vpow2.f32 %v210_v26 }
 0x169   :  { %v328_v30 = vpop.eup %327 }
 0x16a   :  { %v220_v31 = vmul.f32 %v328_v30, %v416_v18  ;;  %v330_v18 = vpop.eup %329 }
 0x16b   :  { %v222_v39 = vmul.f32 %v330_v18, %v221_v38  ;;  %v265_v44 = vmul.f32 %v330_v18, %v264_v43 }
 0x16c   :  { %v223_v32 = vsel %vm171_vm3, %v220_v31, 0.0  ;;  %v231_v33 = vmul.f32 %v220_v31, %v163_v24 }
 0x16d   :  { %224 = vadd.xlane.f32.xlu2 %v223_v32 }
 0x16e   :  { %303 = vmatmul.msk.f32.vlgmr.msra.gmra.mxu2 %vm171_vm3, %v231_v33 }
 0x196   :  { %v255_v35 = vpop.f32.mrf.mxu1 }
 0x197   :  { %v262_v36 = vadd.f32 %v261_v34, %v255_v35 }
 0x199   :  { %263 = vst.msk [vmem:[#allocation7] sm:$0xff] %vm65_vm1, %v262_v36 }
 0x1a0   :  { %v271_v37 = vld [vmem:[#allocation7] sm:$0xff] }
 0x1a1   :  { %272 = vst.msk [vmem:[%s459_s3] sm:$0xff] %vm65_vm1, %v271_v37 }
 0x1e0   :  { %v225_v40 = vpop.xlane.xlu2 %224 }
 0x1e1   :  { %v226_v41 = vadd.f32 %v225_v40, %v222_v39 }
 0x1e3   :  { %228 = vst.msk [vmem:[#allocation5] sm:$0xff] %vm65_vm1, %v226_v41 }
 0x1ea   :  { %v275_v42 = vld [vmem:[#allocation5] sm:$0xff] }
 0x1eb   :  { %276 = vst.msk [vmem:[%s461_s5] sm:$0xff] %vm65_vm1, %v275_v42 }
 0x1f1   :  { %v258_v45 = vpop.f32.mrf.mxu2 }
 0x1f2   :  { %v266_v46 = vadd.f32 %v265_v44, %v258_v45 }
 0x1f4   :  { %267 = vst.msk [vmem:[#allocation6] sm:$0xff] %vm65_vm1, %v266_v46 }
 0x1fb   :  { %v277_v47 = vld [vmem:[#allocation6] sm:$0xff] }
 0x1fc   :  { %278 = vst.msk [vmem:[%s462_s6] sm:$0xff] %vm65_vm1, %v277_v47 }
 0x1fd   :  { %295 = vsyncpa [#allocation9], 1 }

</bundles_post_ra>
